<compile_context>
chip_gen: v7x
topology: tpu7x:2x2x1
jax: 0.10.0
libtpu: 0.0.40
codegen_flags: <defaults>
</compile_context>

<pallas_src>
import jax
import jax.numpy as jnp
from jax.experimental import pallas as pl
from jax.experimental.pallas import tpu as pltpu


def _round_up(a, b):
    return -(-a // b) * b


def _choose_tile(m, tm):
    """Pick the lane-tile along the patch axis M."""
    tm = max(128, (tm // 128) * 128)      # lane-dense (128-multiple) output tiles
    if m < 256:
        return m                          # single full-extent block (legal, tiny)
    # Cap at ~M/2 (rounded up to 128 lanes) so the "parallel" grid axis has at
    # least 2 steps and both v7x TensorCores get work; on v5e/v6e this just means
    # marginally smaller tiles for mid-sized M.
    half = _round_up(-(-m // 2), 128)
    return min(tm, half)


def _patch_embed_ln_kernel(p_ref, w_ref, prm_ref, o_ref):
    # p_ref:   (K, tm)  transposed patch columns (one column per output pixel)
    # w_ref:   (N, K)   flattened conv weights (resident)
    # prm_ref: (N, 8)   packed params: col0=bias, col1=gamma, col2=beta (resident)
    # o_ref:   (N, tm)  transposed output block (lane-dense along the patch axis)
    y = jnp.dot(w_ref[...], p_ref[...],
                preferred_element_type=jnp.float32)            # (N, tm) on MXU
    y = y + prm_ref[:, 0:1]                                    # + conv bias

    n = y.shape[0]                                             # real channel count
    inv_n = jnp.float32(1.0 / n)
    # LayerNorm over channels == over the sublane axis of the transposed tile.
    mean = jnp.sum(y, axis=0, keepdims=True) * inv_n           # (1, tm)
    diff = y - mean
    var = jnp.sum(diff * diff, axis=0, keepdims=True) * inv_n  # (1, tm)
    y_hat = diff * jax.lax.rsqrt(var + jnp.float32(1e-5))
    o_ref[...] = (y_hat * prm_ref[:, 1:2] + prm_ref[:, 2:3]).astype(o_ref.dtype)


def patch_embed_block(x, conv_w, conv_b, ln_g, ln_b, patch_size=4, tm=1024):
    """x: (B, C, H, W) float32 NCHW.  Returns (B, out_chans, H', W') NCHW."""
    ph = pw = patch_size
    B, C, H, W = x.shape
    N = conv_w.shape[0]

    # Pad H/W up to a multiple of the patch size (mirrors F.pad in the module).
    pad_w = (-W) % pw
    pad_h = (-H) % ph
    if pad_w or pad_h:
        x = jnp.pad(x, ((0, 0), (0, 0), (0, pad_h), (0, pad_w)))
    H2, W2 = H + pad_h, W + pad_w
    Hp, Wp = H2 // ph, W2 // pw
    M = B * Hp * Wp
    K = C * ph * pw

    # TODO(synk): this patch-extraction transpose is the remaining extra HBM pass.
    # (B,C,Hp,ph,Wp,pw) -> (C,ph,pw,B,Hp,Wp) -> (K, M); K rows ordered (c,kh,kw),
    # M columns ordered (b,hp,wp).  No K/M/N padding anywhere.
    patches_t = (x.reshape(B, C, Hp, ph, Wp, pw)
                 .transpose(1, 3, 5, 0, 2, 4)
                 .reshape(K, M))

    # Conv2d with kernel == stride == patch is a dense matmul of the flat kernel.
    w_mat = conv_w.reshape(N, K).astype(jnp.float32)           # (N, K)

    # Packed resident parameter block (N x 8): col0 bias, col1 gamma, col2 beta.
    params = jnp.zeros((N, 8), dtype=jnp.float32)
    params = params.at[:, 0].set(conv_b.astype(jnp.float32))
    params = params.at[:, 1].set(ln_g.astype(jnp.float32))
    params = params.at[:, 2].set(ln_b.astype(jnp.float32))

    tm_eff = _choose_tile(M, tm)
    grid_m = pl.cdiv(M, tm_eff)        # ragged last tile handled by Pallas masking

    out_t = pl.pallas_call(
        _patch_embed_ln_kernel,
        out_shape=jax.ShapeDtypeStruct((N, M), x.dtype),
        grid_spec=pltpu.PrefetchScalarGridSpec(
            num_scalar_prefetch=0,
            grid=(grid_m,),
            in_specs=[
                pl.BlockSpec((K, tm_eff), lambda i: (0, i)),   # streaming patches
                pl.BlockSpec((N, K), lambda i: (0, 0)),        # resident weights
                pl.BlockSpec((N, 8), lambda i: (0, 0)),        # resident params
            ],
            out_specs=pl.BlockSpec((N, tm_eff), lambda i: (0, i)),
        ),
        compiler_params=pltpu.CompilerParams(
            dimension_semantics=("parallel",)),
    )(patches_t, w_mat, params)

    # (N, M) -> (N, B, Hp, Wp) -> (B, N, Hp, Wp): cheap leading-axis swap only
    # (contiguous Hp*Wp chunks), no innermost-channel transpose, no slicing.
    return out_t.reshape(N, B, Hp, Wp).transpose(1, 0, 2, 3)


def _reference(x, conv_w, conv_b, ln_g, ln_b, patch_size=4):
    """Pure-JAX reference mirroring the PyTorch forward (incl. the F.pad)."""
    ph = pw = patch_size
    _, _, H, W = x.shape
    pad_w = (-W) % pw
    pad_h = (-H) % ph
    if pad_w or pad_h:
        x = jnp.pad(x, ((0, 0), (0, 0), (0, pad_h), (0, pad_w)))
    y = jax.lax.conv_general_dilated(
        x, conv_w,
        window_strides=(ph, pw),
        padding="VALID",
        dimension_numbers=("NCHW", "OIHW", "NCHW"),
    ) + conv_b[None, :, None, None]
    B, Cc, Hh, Ww = y.shape
    t = y.reshape(B, Cc, Hh * Ww).transpose(0, 2, 1)          # (B, L, C)
    mean = t.mean(-1, keepdims=True)
    var = ((t - mean) ** 2).mean(-1, keepdims=True)
    t = (t - mean) / jnp.sqrt(var + 1e-5) * ln_g + ln_b
    return t.transpose(0, 2, 1).reshape(B, Cc, Hh, Ww)


if __name__ == "__main__":
    patch_size = 4
    in_chans = 3
    out_chans = 96

    key = jax.random.PRNGKey(0)
    kx1, kx2, kw, kb, kg, kbeta = jax.random.split(key, 6)

    conv_w = jax.random.normal(
        kw, (out_chans, in_chans, patch_size, patch_size), dtype=jnp.float32) * 0.05
    conv_b = jax.random.normal(kb, (out_chans,), dtype=jnp.float32) * 0.05
    ln_g = 1.0 + 0.1 * jax.random.normal(kg, (out_chans,), dtype=jnp.float32)
    ln_b = 0.1 * jax.random.normal(kbeta, (out_chans,), dtype=jnp.float32)

    # Case 1: divisible spatial size, tiny M -> single full-extent block.
    x1 = jax.random.normal(kx1, (2, in_chans, 16, 16), dtype=jnp.float32)
    out1 = jax.block_until_ready(
        patch_embed_block(x1, conv_w, conv_b, ln_g, ln_b, patch_size=patch_size))
    ref1 = _reference(x1, conv_w, conv_b, ln_g, ln_b, patch_size=patch_size)
    assert out1.shape == (2, out_chans, 4, 4)
    assert jnp.allclose(out1, ref1, atol=1e-4, rtol=1e-4), "case1 mismatch"

    # Case 2: non-divisible spatial size (exercises the F.pad path), multi-step
    # grid with a ragged last tile (M=360, tm=128 -> 3 grid steps, 104-lane tail).
    x2 = jax.random.normal(kx2, (2, in_chans, 70, 38), dtype=jnp.float32)
    out2 = jax.block_until_ready(
        patch_embed_block(x2, conv_w, conv_b, ln_g, ln_b,
                          patch_size=patch_size, tm=128))
    ref2 = _reference(x2, conv_w, conv_b, ln_g, ln_b, patch_size=patch_size)
    assert out2.shape == (2, out_chans, 18, 10)
    assert jnp.allclose(out2, ref2, atol=1e-4, rtol=1e-4), "case2 mismatch"

    print("KERNEL_OK")
</pallas_src>

<mosaic_0001>
module attributes {stable_mosaic.version = 11 : i64} {
  func.func @_patch_embed_ln_kernel(%arg0: i32, %arg1: memref<48x32xf32, #tpu.memory_space<vmem>>, %arg2: memref<96x48xf32, #tpu.memory_space<vmem>>, %arg3: memref<96x8xf32, #tpu.memory_space<vmem>>, %arg4: memref<96x32xf32, #tpu.memory_space<vmem>>) attributes {dimension_semantics = [#tpu.dimension_semantics<parallel>], iteration_bounds = array<i64: 1>, scalar_prefetch = 0 : i64, scratch_operands = 0 : i64, tpu.core_type = #tpu.core_type<tc>, window_params = [{transform_indices = @transform_0, window_bounds = array<i64: 48, 32>}, {pipeline_mode = #tpu.pipeline_mode<synchronous>, transform_indices = @transform_1, window_bounds = array<i64: 96, 48>}, {pipeline_mode = #tpu.pipeline_mode<synchronous>, transform_indices = @transform_2, window_bounds = array<i64: 96, 8>}, {transform_indices = @transform_3, window_bounds = array<i64: 96, 32>}]} {
    %c0 = arith.constant 0 : index
    %c0_0 = arith.constant 0 : index
    %0 = vector.load %arg2[%c0, %c0_0] : memref<96x48xf32, #tpu.memory_space<vmem>>, vector<96x48xf32>
    %c0_1 = arith.constant 0 : index
    %c0_2 = arith.constant 0 : index
    %1 = vector.load %arg1[%c0_1, %c0_2] : memref<48x32xf32, #tpu.memory_space<vmem>>, vector<48x32xf32>
    %cst = arith.constant dense<0.000000e+00> : vector<96x32xf32>
    %2 = tpu.matmul %0, %1, %cst {dimension_numbers = #tpu.dot_dimension_numbers<[1], [0], [0], [1], [0, 0, 1, 1], [], []>} : vector<96x48xf32>, vector<48x32xf32>, vector<96x32xf32> -> vector<96x32xf32>
    %c0_3 = arith.constant 0 : index
    %c0_4 = arith.constant 0 : index
    %3 = vector.load %arg3[%c0_3, %c0_4] : memref<96x8xf32, #tpu.memory_space<vmem>>, vector<96x1xf32>
    %4 = vector.broadcast %3 : vector<96x1xf32> to vector<96x32xf32>
    %5 = arith.addf %2, %4 : vector<96x32xf32>
    %cst_5 = arith.constant dense<0.000000e+00> : vector<32xf32>
    %6 = vector.multi_reduction <add>, %5, %cst_5 [0] : vector<96x32xf32> to vector<32xf32>
    %7 = vector.shape_cast %6 : vector<32xf32> to vector<1x32xf32>
    %cst_6 = arith.constant 0.010416667 : f32
    %8 = vector.broadcast %cst_6 : f32 to vector<1x32xf32>
    %9 = arith.mulf %7, %8 : vector<1x32xf32>
    %10 = vector.broadcast %9 : vector<1x32xf32> to vector<96x32xf32>
    %11 = arith.subf %5, %10 : vector<96x32xf32>
    %12 = arith.mulf %11, %11 : vector<96x32xf32>
    %cst_7 = arith.constant dense<0.000000e+00> : vector<32xf32>
    %13 = vector.multi_reduction <add>, %12, %cst_7 [0] : vector<96x32xf32> to vector<32xf32>
    %14 = vector.shape_cast %13 : vector<32xf32> to vector<1x32xf32>
    %cst_8 = arith.constant 0.010416667 : f32
    %15 = vector.broadcast %cst_8 : f32 to vector<1x32xf32>
    %16 = arith.mulf %14, %15 : vector<1x32xf32>
    %cst_9 = arith.constant 9.99999974E-6 : f32
    %17 = vector.broadcast %cst_9 : f32 to vector<1x32xf32>
    %18 = arith.addf %16, %17 : vector<1x32xf32>
    %19 = math.rsqrt %18 : vector<1x32xf32>
    %20 = vector.broadcast %19 : vector<1x32xf32> to vector<96x32xf32>
    %21 = arith.mulf %11, %20 : vector<96x32xf32>
    %c0_10 = arith.constant 0 : index
    %c1 = arith.constant 1 : index
    %22 = vector.load %arg3[%c0_10, %c1] : memref<96x8xf32, #tpu.memory_space<vmem>>, vector<96x1xf32>
    %23 = vector.broadcast %22 : vector<96x1xf32> to vector<96x32xf32>
    %24 = arith.mulf %21, %23 : vector<96x32xf32>
    %c0_11 = arith.constant 0 : index
    %c2 = arith.constant 2 : index
    %25 = vector.load %arg3[%c0_11, %c2] : memref<96x8xf32, #tpu.memory_space<vmem>>, vector<96x1xf32>
    %26 = vector.broadcast %25 : vector<96x1xf32> to vector<96x32xf32>
    %27 = arith.addf %24, %26 : vector<96x32xf32>
    %c0_12 = arith.constant 0 : index
    %c0_13 = arith.constant 0 : index
    %28 = vector.load %arg4[%c0_12, %c0_13] : memref<96x32xf32, #tpu.memory_space<vmem>>, vector<96x32xf32>
    tpu.vector_store %arg4[%c0_12, %c0_13], %27 {strides = array<i32>} : memref<96x32xf32, #tpu.memory_space<vmem>>, vector<96x32xf32>,
    return
  }
  func.func @transform_0(%arg0: i32) -> (i32, i32) {
    %c0_i32 = arith.constant 0 : i32
    %c0_i32_0 = arith.constant 0 : i32
    return %c0_i32, %arg0 : i32, i32
  }
  func.func @transform_1(%arg0: i32) -> (i32, i32) {
    %c0_i32 = arith.constant 0 : i32
    %c0_i32_0 = arith.constant 0 : i32
    %c0_i32_1 = arith.constant 0 : i32
    return %c0_i32, %c0_i32_0 : i32, i32
  }
  func.func @transform_2(%arg0: i32) -> (i32, i32) {
    %c0_i32 = arith.constant 0 : i32
    %c0_i32_0 = arith.constant 0 : i32
    %c0_i32_1 = arith.constant 0 : i32
    return %c0_i32, %c0_i32_0 : i32, i32
  }
  func.func @transform_3(%arg0: i32) -> (i32, i32) {
    %c0_i32 = arith.constant 0 : i32
    %c0_i32_0 = arith.constant 0 : i32
    return %c0_i32, %arg0 : i32, i32
  }
}

</mosaic_0001>

<bundles_post_ra>
// kernel: tpu_custom_call.1
= control target key start
LH: loop header
LB: loop body
LE: loop exit
PB: predicated region body
PF: predicated region fallthrough
CT: control target
= control target key end

     0   :  { %v590_v3 = vmov 0   ;;  %vm104_vm0 = vcmask 392192   ;;  %v591_v34 = vmov 1   ;;  %v592_v35 = vmov 2   ;;  %s881_s0 = inlined_call_operand.vmem [shape: f32[48,32], index: 0, kind: input, shape index: {}]   ;;  %s882_s1 = inlined_call_operand.vmem [shape: f32[96,48], index: 1, kind: input, shape index: {}]   ;;  %s883_s2 = inlined_call_operand.vmem [shape: f32[96,8], index: 2, kind: input, shape index: {}]   ;;  %s884_s3 = inlined_call_operand.vmem [shape: f32[96,32], index: 3, kind: output, shape index: {}]  }
   0x1   :  { %v26_v0 = vld [vmem:[%s881_s0] sm:$0xff]  ;;  %v27_v1 = vld [vmem:[%s881_s0 + $0x8] sm:$0xff]  ;;  %v28_v2 = vld [vmem:[%s881_s0 + $0x10] sm:$0xff]  ;;  %582 = vset.pattern.permute.xlu0 %v590_v3  ;;  %583 = vset.pattern.permute.xlu1 %v590_v3  ;;  %vm266_vm1 = vcmask 261120  }
   0x2   :  { %v561_v4 = vpack.c.bf16 %v27_v1, %v26_v0  ;;  %v29_v5 = vld [vmem:[%s881_s0 + $0x18] sm:$0xff]  ;;  %v30_v7 = vld [vmem:[%s881_s0 + $0x20] sm:$0xff]  ;;  %v31_v8 = vld [vmem:[%s881_s0 + $0x28] sm:$0xff] }
   0x3   :  { %v565_v6 = vpack.c.bf16 %v29_v5, %v28_v2  ;;  %v14_v9 = vld [vmem:[%s882_s1] sm:$0xff]  ;;  %v20_v10 = vld [vmem:[%s882_s1 + $0x30] sm:$0xff]  ;;  %v569_v11 = vpack.c.bf16 %v31_v8, %v30_v7  ;;  %v33_v14 = vld [vmem:[%s883_s2 + $0x8] sm:$0xff] }
   0x4   :  { %562 = vmatprep.subr.bf16.mxu0 %v561_v4  ;;  %573 = vmatprep.subr.bf16.mxu1 %v561_v4  ;;  %v642_v12 = vld [vmem:[%s883_s2] sm:$0xff]  ;;  %v647_v13 = vld [vmem:[%s883_s2 + $0x10] sm:$0xff]  ;;  %v657_v15 = vld [vmem:[%s883_s2 + $0x18] sm:$0xff] }
   0x5   :  { %564 = vmatpush3.bf16.msra.mxu0 %v561_v4  ;;  %576 = vmatpush3.bf16.msra.mxu1 %v561_v4  ;;  %v15_v16 = vld [vmem:[%s882_s1 + $0x8] sm:$0xff]  ;;  %v21_v17 = vld [vmem:[%s882_s1 + $0x38] sm:$0xff]  ;;  %v16_v18 = vld [vmem:[%s882_s1 + $0x10] sm:$0xff] }
   0x6   :  { %566 = vmatprep.subr.bf16.mxu0 %v565_v6  ;;  %574 = vmatprep.subr.bf16.mxu1 %v565_v6  ;;  %v22_v19 = vld [vmem:[%s882_s1 + $0x40] sm:$0xff]  ;;  %v37_v21 = vld [vmem:[%s883_s2 + $0x28] sm:$0xff]  ;;  %v17_v22 = vld [vmem:[%s882_s1 + $0x18] sm:$0xff] }
   0x7   :  { %543 = vmatprep.mubr.msk.f32.mxu0 %vm104_vm0, %v14_v9  ;;  %552 = vmatprep.mubr.msk.f32.mxu1 %vm104_vm0, %v20_v10  ;;  %v36_v20 = vld [vmem:[%s883_s2 + $0x20] sm:$0xff]  ;;  %v23_v23 = vld [vmem:[%s882_s1 + $0x48] sm:$0xff]  ;;  %v24_v25 = vld [vmem:[%s882_s1 + $0x50] sm:$0xff] }
   0x8   :  { %46 = vperm.xlu0 %582, %v642_v12   ;;  %56 = vperm.xlu1 %583, %v647_v13   ;;  %v18_v24 = vld [vmem:[%s882_s1 + $0x20] sm:$0xff]  ;;  %v38_v26 = vld [vmem:[%s883_s2 + $0x30] sm:$0xff]  ;;  %v39_v27 = vld [vmem:[%s883_s2 + $0x38] sm:$0xff] }
   0x9   :  { %568 = vmatpush3.bf16.msra.mxu0 %v565_v6  ;;  %577 = vmatpush3.bf16.msra.mxu1 %v565_v6  ;;  %v19_v28 = vld [vmem:[%s882_s1 + $0x28] sm:$0xff]  ;;  %v25_v29 = vld [vmem:[%s882_s1 + $0x58] sm:$0xff]  ;;  %v40_v30 = vld [vmem:[%s883_s2 + $0x40] sm:$0xff] }
   0xa   :  { %570 = vmatprep.subr.bf16.mxu0 %v569_v11  ;;  %575 = vmatprep.subr.bf16.mxu1 %v569_v11  ;;  %v41_v31 = vld [vmem:[%s883_s2 + $0x48] sm:$0xff]  ;;  %v42_v32 = vld [vmem:[%s883_s2 + $0x50] sm:$0xff]  ;;  %v43_v33 = vld [vmem:[%s883_s2 + $0x58] sm:$0xff] }
   0xc   :  { %51 = vperm.xlu0 %582, %v33_v14   ;;  %61 = vperm.xlu1 %583, %v657_v15  }
   0xd   :  { %572 = vmatpush3.bf16.msra.mxu0 %v569_v11  ;;  %578 = vmatpush3.bf16.msra.mxu1 %v569_v11 }
  0x10   :  { %544 = vmatmul.mubr.msk.f32.vlgmr.msra.gmra.mrb[0].mxu0 %vm104_vm0, %v15_v16  ;;  %553 = vmatmul.mubr.msk.f32.vlgmr.msra.gmra.mrb[0].mxu1 %vm104_vm0, %v21_v17 }
  0x11   :  { %546 = vmatprep.mubr.msk.f32.mxu0 %vm104_vm0, %v16_v18  ;;  %555 = vmatprep.mubr.msk.f32.mxu1 %vm104_vm0, %v22_v19 }
  0x12   :  { %66 = vperm.xlu0 %582, %v36_v20   ;;  %71 = vperm.xlu1 %583, %v37_v21  }
  0x14   :  { %547 = vmatmul.mubr.msk.f32.gmra.mrb[2].mxu0 %vm104_vm0, %v17_v22  ;;  %556 = vmatmul.mubr.msk.f32.gmra.mrb[2].mxu1 %vm104_vm0, %v23_v23 }
  0x15   :  { %549 = vmatprep.mubr.msk.f32.mxu0 %vm104_vm0, %v18_v24  ;;  %558 = vmatprep.mubr.msk.f32.mxu1 %vm104_vm0, %v24_v25 }
  0x16   :  { %76 = vperm.xlu0 %582, %v38_v26   ;;  %81 = vperm.xlu1 %583, %v39_v27  }
  0x18   :  { %550 = vmatmul.mubr.msk.f32.gmra.mrb[4].mxu0 %vm104_vm0, %v19_v28  ;;  %559 = vmatmul.mubr.msk.f32.gmra.mrb[4].mxu1 %vm104_vm0, %v25_v29 }
  0x1a   :  { %86 = vperm.xlu0 %582, %v40_v30   ;;  %91 = vperm.xlu1 %583, %v41_v31  }
  0x1e   :  { %96 = vperm.xlu0 %582, %v42_v32   ;;  %101 = vperm.xlu1 %583, %v43_v33  }
  0x22   :  { %585 = vset.pattern.permute.xlu1 %v591_v34  ;;  %584 = vset.pattern.permute.xlu0 %v591_v34 }
  0x23   :  { %370 = vperm.xlu1 %585, %v33_v14   ;;  %366 = vperm.xlu0 %584, %v642_v12  }
  0x27   :  { %374 = vperm.xlu1 %585, %v647_v13   ;;  %378 = vperm.xlu0 %584, %v657_v15  }
  0x2b   :  { %382 = vperm.xlu1 %585, %v36_v20   ;;  %386 = vperm.xlu0 %584, %v37_v21  }
  0x2f   :  { %390 = vperm.xlu1 %585, %v38_v26   ;;  %394 = vperm.xlu0 %584, %v39_v27  }
  0x33   :  { %398 = vperm.xlu1 %585, %v40_v30   ;;  %402 = vperm.xlu0 %584, %v41_v31  }
  0x37   :  { %406 = vperm.xlu1 %585, %v42_v32   ;;  %410 = vperm.xlu0 %584, %v43_v33  }
  0x3b   :  { %586 = vset.pattern.permute.xlu1 %v592_v35  ;;  %587 = vset.pattern.permute.xlu0 %v592_v35 }
  0x3c   :  { %426 = vperm.xlu1 %586, %v642_v12   ;;  %430 = vperm.xlu0 %587, %v33_v14  }
  0x40   :  { %434 = vperm.xlu1 %586, %v647_v13   ;;  %442 = vperm.xlu0 %587, %v36_v20  }
  0x44   :  { %438 = vperm.xlu1 %586, %v657_v15   ;;  %450 = vperm.xlu0 %587, %v38_v26  }
  0x48   :  { %446 = vperm.xlu1 %586, %v37_v21   ;;  %458 = vperm.xlu0 %587, %v40_v30  }
  0x4c   :  { %454 = vperm.xlu1 %586, %v39_v27   ;;  %466 = vperm.xlu0 %587, %v42_v32  }
  0x50   :  { %462 = vperm.xlu1 %586, %v41_v31  }
  0x54   :  { %470 = vperm.xlu1 %586, %v43_v33  }
  0x87   :  { %v47_v36 = vpop.permute.xlu0 %46  ;;  %v57_v37 = vpop.permute.xlu1 %56 }
  0x8b   :  { %v52_v38 = vpop.permute.xlu0 %51  ;;  %v62_v39 = vpop.permute.xlu1 %61 }
  0x91   :  { %v67_v40 = vpop.permute.xlu0 %66  ;;  %v72_v41 = vpop.permute.xlu1 %71 }
  0x95   :  { %v77_v57 = vpop.permute.xlu0 %76  ;;  %v82_v58 = vpop.permute.xlu1 %81 }
  0x99   :  { %v87_v7 = vpop.permute.xlu0 %86  ;;  %v92_v11 = vpop.permute.xlu1 %91 }
  0x9d   :  { %v97_v18 = vpop.permute.xlu0 %96  ;;  %v102_v22 = vpop.permute.xlu1 %101 }
  0xa2   :  { %v745_v35 = vpop.permute.xlu1 %370 }
  0xe3   :  { %v545_v42 = vpop.f32.mrb[0].mxu0  ;;  %v554_v43 = vpop.f32.mrb[0].mxu1 }
  0xe4   :  { %v730_v44 = vadd.f32 %v545_v42, %v52_v38  ;;  %v207_v45 = vpop.f32.mrb[1].mxu0  ;;  %v237_v46 = vpop.f32.mrb[1].mxu1  ;;  %v243_v9 = vadd.f32 %v554_v43, %v82_v58 }
  0xe5   :  { %v208_v47 = vadd.f32 %v207_v45, %v47_v36  ;;  %v238_v5 = vadd.f32 %v237_v46, %v77_v57  ;;  %v782_v57 = vpop.permute.xlu0 %366 }
  0xe6   :  { %v268_v48 = vsel %vm266_vm1, %v730_v44, 0.0  ;;  %v280_v16 = vsel %vm266_vm1, %v243_v9, 0.0 }
  0xe7   :  { %v267_v49 = vsel %vm266_vm1, %v208_v47, 0.0  ;;  %v548_v50 = vpop.f32.mrb[2].mxu0  ;;  %v557_v51 = vpop.f32.mrb[2].mxu1  ;;  %v278_v13 = vsel %vm266_vm1, %v238_v5, 0.0 }
  0xe8   :  { %v269_v52 = vadd.f32 %v268_v48, %v267_v49  ;;  %v217_v53 = vpop.f32.mrb[3].mxu0  ;;  %v247_v54 = vpop.f32.mrb[3].mxu1  ;;  %v223_v55 = vadd.f32 %v548_v50, %v62_v39  ;;  %v253_v17 = vadd.f32 %v557_v51, %v92_v11 }
  0xe9   :  { %v218_v56 = vadd.f32 %v217_v53, %v57_v37  ;;  %v248_v14 = vadd.f32 %v247_v54, %v87_v7  ;;  %v747_v39 = vpop.permute.xlu1 %374 }
  0xea   :  { %v272_v1 = vsel %vm266_vm1, %v223_v55, 0.0  ;;  %v284_v24 = vsel %vm266_vm1, %v253_v17, 0.0 }
  0xeb   :  { %v270_v59 = vsel %vm266_vm1, %v218_v56, 0.0  ;;  %v551_v60 = vpop.f32.mrb[4].mxu0  ;;  %v560_v61 = vpop.f32.mrb[4].mxu1  ;;  %v282_v20 = vsel %vm266_vm1, %v248_v14, 0.0 }
  0xec   :  { %v271_v62 = vadd.f32 %v270_v59, %v269_v52  ;;  %v227_v63 = vpop.f32.mrb[5].mxu0  ;;  %v257_v0 = vpop.f32.mrb[5].mxu1  ;;  %v233_v2 = vadd.f32 %v551_v60, %v72_v41  ;;  %v263_v25 = vadd.f32 %v560_v61, %v102_v22 }
  0xed   :  { %v228_v3 = vadd.f32 %v227_v63, %v67_v40  ;;  %v258_v21 = vadd.f32 %v257_v0, %v97_v18 }
  0xee   :  { %v273_v4 = vadd.f32 %v272_v1, %v271_v62  ;;  %v276_v10 = vsel %vm266_vm1, %v233_v2, 0.0  ;;  %v288_v29 = vsel %vm266_vm1, %v263_v25, 0.0 }
  0xef   :  { %v274_v6 = vsel %vm266_vm1, %v228_v3, 0.0  ;;  %v286_v27 = vsel %vm266_vm1, %v258_v21, 0.0 }
  0xf0   :  { %v275_v8 = vadd.f32 %v274_v6, %v273_v4  ;;  %v379_v4 = vpop.permute.xlu0 %378 }
  0xf2   :  { %v277_v12 = vadd.f32 %v276_v10, %v275_v8 }
  0xf4   :  { %v279_v15 = vadd.f32 %v278_v13, %v277_v12 }
  0xf6   :  { %v281_v19 = vadd.f32 %v280_v16, %v279_v15  ;;  %v387_v15 = vpop.permute.xlu0 %386 }
  0xf8   :  { %v283_v23 = vadd.f32 %v282_v20, %v281_v19 }
  0xfa   :  { %v285_v26 = vadd.f32 %v284_v24, %v283_v23 }
  0xfc   :  { %v287_v28 = vadd.f32 %v286_v27, %v285_v26  ;;  %v395_v26 = vpop.permute.xlu0 %394 }
  0xfe   :  { %v289_v30 = vadd.f32 %v288_v29, %v287_v28 }
 0x100   :  { %v290_v31 = vrot.slane %v289_v30, 4 }
 0x102   :  { %v291_v32 = vadd.f32 %v290_v31, %v289_v30 }
 0x104   :  { %v292_v33 = vrot.slane %v291_v32, 2 }
 0x106   :  { %v293_v34 = vadd.f32 %v292_v33, %v291_v32  ;;  %v403_v33 = vpop.permute.xlu0 %402 }
 0x108   :  { %v294_v36 = vrot.slane %v293_v34, 1 }
 0x10a   :  { %v295_v37 = vadd.f32 %v294_v36, %v293_v34 }
 0x10c   :  { %v296_v38 = vmul.f32 0.010416667, %v295_v37 }
 0x10e   :  { %v749_v40 = vsub.f32 %v208_v47, %v296_v38  ;;  %v751_v41 = vsub.f32 %v218_v56, %v296_v38  ;;  %v753_v42 = vsub.f32 %v223_v55, %v296_v38  ;;  %v755_v43 = vsub.f32 %v228_v3, %v296_v38  ;;  %v780_v56 = vpop.permute.xlu1 %382 }
 0x10f   :  { %v757_v45 = vsub.f32 %v233_v2, %v296_v38  ;;  %v759_v46 = vsub.f32 %v238_v5, %v296_v38  ;;  %v761_v48 = vsub.f32 %v243_v9, %v296_v38  ;;  %v763_v49 = vsub.f32 %v248_v14, %v296_v38 }
 0x110   :  { %v765_v50 = vsub.f32 %v253_v17, %v296_v38  ;;  %v767_v51 = vsub.f32 %v258_v21, %v296_v38  ;;  %v769_v47 = vsub.f32 %v263_v25, %v296_v38  ;;  %v772_v52 = vsub.f32 %v730_v44, %v296_v38 }
 0x111   :  { %v309_v53 = vmul.f32 %v749_v40, %v749_v40  ;;  %v311_v55 = vmul.f32 %v751_v41, %v751_v41  ;;  %v312_v58 = vmul.f32 %v753_v42, %v753_v42  ;;  %v313_v61 = vmul.f32 %v755_v43, %v755_v43 }
 0x112   :  { %v310_v54 = vmul.f32 %v772_v52, %v772_v52  ;;  %v314_v0 = vmul.f32 %v757_v45, %v757_v45  ;;  %v794_v2 = vpop.permute.xlu1 %390  ;;  %v315_v5 = vmul.f32 %v759_v46, %v759_v46  ;;  %v316_v8 = vmul.f32 %v761_v48, %v761_v48 }
 0x113   :  { %v321_v59 = vsel %vm266_vm1, %v309_v53, 0.0  ;;  %v324_v62 = vsel %vm266_vm1, %v311_v55, 0.0  ;;  %v326_v1 = vsel %vm266_vm1, %v312_v58, 0.0  ;;  %v328_v6 = vsel %vm266_vm1, %v313_v61, 0.0  ;;  %v411_v53 = vpop.permute.xlu0 %410 }
 0x114   :  { %v322_v44 = vsel %vm266_vm1, %v310_v54, 0.0  ;;  %v330_v9 = vsel %vm266_vm1, %v314_v0, 0.0  ;;  %v317_v11 = vmul.f32 %v763_v49, %v763_v49  ;;  %v332_v12 = vsel %vm266_vm1, %v315_v5, 0.0 }
 0x115   :  { %v323_v60 = vadd.f32 %v322_v44, %v321_v59  ;;  %v318_v16 = vmul.f32 %v765_v50, %v765_v50  ;;  %v334_v17 = vsel %vm266_vm1, %v316_v8, 0.0  ;;  %v319_v19 = vmul.f32 %v767_v51, %v767_v51 }
 0x116   :  { %v399_v13 = vpop.permute.xlu1 %398  ;;  %v336_v20 = vsel %vm266_vm1, %v317_v11, 0.0  ;;  %v320_v22 = vmul.f32 %v769_v47, %v769_v47 }
 0x117   :  { %v325_v63 = vadd.f32 %v324_v62, %v323_v60  ;;  %v338_v23 = vsel %vm266_vm1, %v318_v16, 0.0  ;;  %v340_v27 = vsel %vm266_vm1, %v319_v19, 0.0  ;;  %v431_v58 = vpop.permute.xlu0 %430 }
 0x118   :  { %v342_v29 = vsel %vm266_vm1, %v320_v22, 0.0 }
 0x119   :  { %v327_v3 = vadd.f32 %v326_v1, %v325_v63 }
 0x11a   :  { %v407_v24 = vpop.permute.xlu1 %406 }
 0x11b   :  { %v329_v7 = vadd.f32 %v328_v6, %v327_v3  ;;  %v443_v61 = vpop.permute.xlu0 %442 }
 0x11d   :  { %v331_v10 = vadd.f32 %v330_v9, %v329_v7 }
 0x11e   :  { %v427_v31 = vpop.permute.xlu1 %426 }
 0x11f   :  { %v333_v14 = vadd.f32 %v332_v12, %v331_v10  ;;  %v451_v63 = vpop.permute.xlu0 %450 }
 0x121   :  { %v335_v18 = vadd.f32 %v334_v17, %v333_v14 }
 0x122   :  { %v435_v37 = vpop.permute.xlu1 %434 }
 0x123   :  { %v337_v21 = vadd.f32 %v336_v20, %v335_v18  ;;  %v459_v12 = vpop.permute.xlu0 %458 }
 0x125   :  { %v339_v25 = vadd.f32 %v338_v23, %v337_v21 }
 0x126   :  { %v439_v59 = vpop.permute.xlu1 %438 }
 0x127   :  { %v341_v28 = vadd.f32 %v340_v27, %v339_v25 }
 0x129   :  { %v343_v30 = vadd.f32 %v342_v29, %v341_v28 }
 0x12a   :  { %v447_v62 = vpop.permute.xlu1 %446 }
 0x12b   :  { %v344_v32 = vrot.slane %v343_v30, 4 }
 0x12d   :  { %v345_v34 = vadd.f32 %v344_v32, %v343_v30 }
 0x12e   :  { %v455_v0 = vpop.permute.xlu1 %454 }
 0x12f   :  { %v346_v36 = vrot.slane %v345_v34, 2 }
 0x131   :  { %v347_v38 = vadd.f32 %v346_v36, %v345_v34 }
 0x133   :  { %v348_v54 = vrot.slane %v347_v38, 1 }
 0x135   :  { %v349_v55 = vadd.f32 %v348_v54, %v347_v38 }
 0x137   :  { %v350_v44 = vmul.f32 0.010416667, %v349_v55 }
 0x139   :  { %v351_v60 = vadd.f32 1e-05, %v350_v44 }
 0x13b   :  { %588 = vrsqrt.f32 %v351_v60 }
 0x145   :  { %v589_v1 = vpop.eup %588 }
 0x146   :  { %v354_v3 = vmul.f32 %v589_v1, %v772_v52  ;;  %v355_v5 = vmul.f32 %v589_v1, %v751_v41  ;;  %v357_v6 = vmul.f32 %v589_v1, %v755_v43  ;;  %v353_v7 = vmul.f32 %v589_v1, %v749_v40  ;;  %v463_v43 = vpop.permute.xlu1 %462 }
 0x147   :  { %v359_v8 = vmul.f32 %v589_v1, %v759_v46  ;;  %v356_v9 = vmul.f32 %v589_v1, %v753_v42  ;;  %v361_v10 = vmul.f32 %v589_v1, %v763_v49  ;;  %v358_v11 = vmul.f32 %v589_v1, %v757_v45 }
 0x148   :  { %v414_v14 = vmul.f32 %v745_v35, %v354_v3  ;;  %v415_v16 = vmul.f32 %v747_v39, %v355_v5  ;;  %v417_v52 = vmul.f32 %v780_v56, %v357_v6  ;;  %v413_v41 = vmul.f32 %v782_v57, %v353_v7 }
 0x149   :  { %v419_v40 = vmul.f32 %v794_v2, %v359_v8  ;;  %v416_v17 = vmul.f32 %v379_v4, %v356_v9  ;;  %v421_v46 = vmul.f32 %v399_v13, %v361_v10  ;;  %v418_v18 = vmul.f32 %v387_v15, %v358_v11  ;;  %v467_v13 = vpop.permute.xlu0 %466 }
 0x14a   :  { %v363_v42 = vmul.f32 %v589_v1, %v767_v51  ;;  %v360_v49 = vmul.f32 %v589_v1, %v761_v48  ;;  %v473_v45 = vadd.f32 %v427_v31, %v413_v41  ;;  %v362_v19 = vmul.f32 %v589_v1, %v765_v50  ;;  %v471_v23 = vpop.permute.xlu1 %470 }
 0x14b   :  { %v475_v35 = vadd.f32 %v435_v37, %v415_v16  ;;  %v364_v39 = vmul.f32 %v589_v1, %v769_v47  ;;  %v476_v20 = vadd.f32 %v439_v59, %v416_v17  ;;  %v478_v56 = vadd.f32 %v447_v62, %v418_v18 }
 0x14c   :  { %v423_v21 = vmul.f32 %v407_v24, %v363_v42  ;;  %v420_v57 = vmul.f32 %v395_v26, %v360_v49  ;;  %485 = vst.msk [vmem:[%s884_s3] sm:$0xff] %vm266_vm1, %v473_v45  ;;  %v422_v2 = vmul.f32 %v403_v33, %v362_v19  ;;  %v474_v4 = vadd.f32 %v431_v58, %v414_v14 }
 0x14d   :  { %487 = vst.msk [vmem:[%s884_s3 + $0x10] sm:$0xff] %vm266_vm1, %v475_v35  ;;  %v424_v48 = vmul.f32 %v411_v53, %v364_v39  ;;  %488 = vst.msk [vmem:[%s884_s3 + $0x18] sm:$0xff] %vm266_vm1, %v476_v20  ;;  %v477_v50 = vadd.f32 %v443_v61, %v417_v52  ;;  %v479_v51 = vadd.f32 %v451_v63, %v419_v40 }
 0x14e   :  { %490 = vst.msk [vmem:[%s884_s3 + $0x28] sm:$0xff] %vm266_vm1, %v478_v56  ;;  %v481_v47 = vadd.f32 %v459_v12, %v421_v46  ;;  %v480_v15 = vadd.f32 %v455_v0, %v420_v57  ;;  %486 = vst.msk [vmem:[%s884_s3 + $0x8] sm:$0xff] %vm266_vm1, %v474_v4  ;;  %v482_v22 = vadd.f32 %v463_v43, %v422_v2 }
 0x14f   :  { %v483_v24 = vadd.f32 %v467_v13, %v423_v21  ;;  %489 = vst.msk [vmem:[%s884_s3 + $0x20] sm:$0xff] %vm266_vm1, %v477_v50  ;;  %v484_v25 = vadd.f32 %v471_v23, %v424_v48  ;;  %491 = vst.msk [vmem:[%s884_s3 + $0x30] sm:$0xff] %vm266_vm1, %v479_v51 }
 0x150   :  { %493 = vst.msk [vmem:[%s884_s3 + $0x40] sm:$0xff] %vm266_vm1, %v481_v47  ;;  %492 = vst.msk [vmem:[%s884_s3 + $0x38] sm:$0xff] %vm266_vm1, %v480_v15 }
 0x151   :  { %494 = vst.msk [vmem:[%s884_s3 + $0x48] sm:$0xff] %vm266_vm1, %v482_v22  ;;  %495 = vst.msk [vmem:[%s884_s3 + $0x50] sm:$0xff] %vm266_vm1, %v483_v24 }
 0x152   :  { %496 = vst.msk [vmem:[%s884_s3 + $0x58] sm:$0xff] %vm266_vm1, %v484_v25 }

</bundles_post_ra>
